<compile_context>
chip_gen: v7x
topology: tpu7x:2x2x1
jax: 0.10.0
libtpu: 0.0.40
codegen_flags: <defaults>
</compile_context>

<pallas_src>
import jax
import jax.numpy as jnp
from jax.experimental import pallas as pl
from jax.experimental.pallas import tpu as pltpu


# ----------------------------------------------------------------------------
# Fused kernel: 1x1 conv - relu - 1x1 conv  +  per-tile pooling statistics
# ----------------------------------------------------------------------------
def conv_fused_kernel(x_ref, w1t_ref, b1_ref, w2t_ref, b2_ref,
                      y_ref, xsum_ref, ysum_ref):
    """One (batch, spatial-tile) step of the fused DenseCL neck.

    x_ref   : [1, C, tHW]    input tile, native channels-major layout
    w1t_ref : [hid, C]       first 1x1-conv weight, transposed
    b1_ref  : [hid, 1]
    w2t_ref : [out, hid]     second 1x1-conv weight, transposed
    b2_ref  : [out, 1]
    y_ref   : [1, out, tHW]  conv-MLP output tile (lane-dense on tHW)
    xsum_ref: [1, 1, 1, C]   per-tile channel sums of x (lane-dense on C)
    ysum_ref: [1, 1, 1, 1]   per-tile sum of all y elements (x3)
    """
    x = x_ref[0]                                                   # [C, tHW]
    C = x.shape[0]

    # Partial channel sums of x (AdaptiveAvgPool2d of the fc path, finished in jnp).
    # Stored with C on the lane axis -> unmasked vector stores for production C.
    xsum_ref[...] = jnp.sum(x.astype(jnp.float32), axis=-1).reshape(1, 1, 1, C)

    # 1x1 Conv2d == per-pixel matmul over channels, computed in [C, HW] layout so the
    # output comes out directly as [out_dim, HW] (PyTorch's x2.view layout).
    h = jnp.dot(w1t_ref[...], x, preferred_element_type=jnp.float32) + b1_ref[...]
    h = jnp.maximum(h, 0.0)                                        # ReLU   [hid, tHW]
    y = jnp.dot(w2t_ref[...], h.astype(w2t_ref.dtype),
                preferred_element_type=jnp.float32) + b2_ref[...]  # [out, tHW]

    y_ref[0] = y.astype(y_ref.dtype)
    ysum_ref[...] = jnp.sum(y).reshape(1, 1, 1, 1)


def _pick_tile_hw(hw):
    for t in (512, 384, 256, 128):
        if hw % t == 0:
            return t
    # TODO(synk): pad HW up to a multiple of 128 for odd spatial extents instead of
    # falling back to a single whole-image tile.
    return hw


# ----------------------------------------------------------------------------
# Wrapper
# ----------------------------------------------------------------------------
def projection_conv_forward(x_nchw, params, s=None,
                            compute_dtype=jnp.float32, tile_hw=None):
    """x_nchw: [B, C, H, W] float32. Returns (x, x1, x2, x3) like the PyTorch module."""
    # TODO(synk): adaptive pooling for arbitrary `s` (self.pool) not implemented.
    assert s is None, "only the s=None path is implemented"
    w1_fc, b1_fc, w2_fc, b2_fc, w1_cv, b1_cv, w2_cv, b2_cv = params

    B, C, H, W = x_nchw.shape
    HW = H * W
    hid = w1_cv.shape[1]
    out_dim = w2_cv.shape[1]

    if tile_hw is None:
        tile_hw = _pick_tile_hw(HW)
    assert HW % tile_hw == 0, (HW, tile_hw)
    n_tiles = HW // tile_hw

    # Native layout: contiguous reshape only (no transposes); x is read from HBM once.
    x_bcl = x_nchw.reshape(B, C, HW).astype(compute_dtype)
    w1t = w1_cv.T.astype(compute_dtype)                    # [hid, C]
    w2t = w2_cv.T.astype(compute_dtype)                    # [out, hid]
    b1c = b1_cv.reshape(hid, 1).astype(jnp.float32)        # biases added to f32 accumulators
    b2c = b2_cv.reshape(out_dim, 1).astype(jnp.float32)

    # TODO(synk): for production widths (hid=2048) add pipeline_mode=pl.Buffered(1) on the
    # grid-invariant weight specs, raise vmem_limit_bytes, and/or tile the hid contraction
    # (v5e 16 MiB scoped-VMEM default / v7x 64 MiB physical VMEM budgets).
    y, xsum, ysum = pl.pallas_call(
        conv_fused_kernel,
        grid=(B, n_tiles),
        in_specs=[
            pl.BlockSpec((1, C, tile_hw), lambda b, t: (b, 0, t)),
            pl.BlockSpec((hid, C), lambda b, t: (0, 0)),
            pl.BlockSpec((hid, 1), lambda b, t: (0, 0)),
            pl.BlockSpec((out_dim, hid), lambda b, t: (0, 0)),
            pl.BlockSpec((out_dim, 1), lambda b, t: (0, 0)),
        ],
        out_specs=[
            pl.BlockSpec((1, out_dim, tile_hw), lambda b, t: (b, 0, t)),
            pl.BlockSpec((1, 1, 1, C), lambda b, t: (b, t, 0, 0)),
            pl.BlockSpec((1, 1, 1, 1), lambda b, t: (b, t, 0, 0)),
        ],
        out_shape=[
            jax.ShapeDtypeStruct((B, out_dim, HW), jnp.float32),
            jax.ShapeDtypeStruct((B, n_tiles, 1, C), jnp.float32),
            jax.ShapeDtypeStruct((B, n_tiles, 1, 1), jnp.float32),
        ],
        compiler_params=pltpu.CompilerParams(
            dimension_semantics=("parallel", "parallel")),
    )(x_bcl, w1t, b1c, w2t, b2c)

    # fc path: finish the global average pool from the per-tile channel sums and run the
    # tiny [B, C] MLP in plain jnp (no second HBM read of x, no standalone kernel).
    pooled = jnp.sum(xsum, axis=(1, 2)) / HW                        # [B, C]
    x1 = jnp.maximum(pooled @ w1_fc + b1_fc, 0.0) @ w2_fc + b2_fc   # [B, out_dim]

    x2 = y                                                          # [B, out_dim, HW]
    x3 = (jnp.sum(ysum, axis=(1, 2, 3)) / (out_dim * HW)).reshape(B, 1)
    return x_nchw, x1, x2, x3


# ----------------------------------------------------------------------------
# Params + pure-jnp reference
# ----------------------------------------------------------------------------
def init_params(key, in_dim, hid_dim, out_dim):
    ks = jax.random.split(key, 8)
    scale = lambda fan_in: 1.0 / jnp.sqrt(fan_in)
    # Linear weights stored as [in, out]; Conv2d 1x1 weights stored as [in, out].
    w1_fc = jax.random.normal(ks[0], (in_dim, hid_dim), jnp.float32) * scale(in_dim)
    b1_fc = jax.random.normal(ks[1], (hid_dim,), jnp.float32) * 0.01
    w2_fc = jax.random.normal(ks[2], (hid_dim, out_dim), jnp.float32) * scale(hid_dim)
    b2_fc = jax.random.normal(ks[3], (out_dim,), jnp.float32) * 0.01
    w1_cv = jax.random.normal(ks[4], (in_dim, hid_dim), jnp.float32) * scale(in_dim)
    b1_cv = jax.random.normal(ks[5], (hid_dim,), jnp.float32) * 0.01
    w2_cv = jax.random.normal(ks[6], (hid_dim, out_dim), jnp.float32) * scale(hid_dim)
    b2_cv = jax.random.normal(ks[7], (out_dim,), jnp.float32) * 0.01
    return (w1_fc, b1_fc, w2_fc, b2_fc, w1_cv, b1_cv, w2_cv, b2_cv)


def reference_forward(x, params):
    """Pure-jnp reference mirroring the PyTorch module (s=None)."""
    w1_fc, b1_fc, w2_fc, b2_fc, w1_cv, b1_cv, w2_cv, b2_cv = params
    B, C, H, W = x.shape
    pooled = jnp.mean(x, axis=(2, 3))                               # [B, C]
    x1 = jnp.maximum(pooled @ w1_fc + b1_fc, 0.0) @ w2_fc + b2_fc
    xl = jnp.transpose(x, (0, 2, 3, 1)).reshape(B, H * W, C)
    h = jnp.maximum(xl @ w1_cv + b1_cv, 0.0)
    y = h @ w2_cv + b2_cv                                           # [B, HW, out]
    x2 = jnp.transpose(y, (0, 2, 1))                                # [B, out, HW]
    x3 = jnp.mean(x2, axis=(1, 2), keepdims=False)[:, None]         # [B, 1]
    return x, x1, x2, x3


if __name__ == "__main__":
    B, C, H, W = 2, 4, 16, 16
    hid_dim, out_dim = 32, 8

    key = jax.random.PRNGKey(0)
    kx, kp = jax.random.split(key)
    x = jax.random.normal(kx, (B, C, H, W), jnp.float32)
    params = init_params(kp, C, hid_dim, out_dim)

    refs = reference_forward(x, params)

    # f32 compute, forced 128-wide spatial tiles (exercises the multi-tile partial-sum path).
    outs = jax.block_until_ready(projection_conv_forward(x, params, tile_hw=128))
    for o, r in zip(outs, refs):
        assert o.shape == r.shape, (o.shape, r.shape)
        assert jnp.allclose(o, r, atol=1e-4, rtol=1e-4)

    # bf16 compute path (v6e / v7x MXU-friendly), default tile size; looser tolerance.
    outs_bf16 = jax.block_until_ready(
        projection_conv_forward(x, params, compute_dtype=jnp.bfloat16))
    for o, r in zip(outs_bf16, refs):
        assert o.shape == r.shape, (o.shape, r.shape)
        assert jnp.allclose(o.astype(jnp.float32), r, atol=5e-2, rtol=5e-2)

    print("KERNEL_OK")
</pallas_src>

<mosaic_0001>
module attributes {stable_mosaic.version = 11 : i64} {
  func.func @conv_fused_kernel(%arg0: i32, %arg1: i32, %arg2: memref<1x4x128xf32, #tpu.memory_space<vmem>>, %arg3: memref<32x4xf32, #tpu.memory_space<vmem>>, %arg4: memref<32x1xf32, #tpu.memory_space<vmem>>, %arg5: memref<8x32xf32, #tpu.memory_space<vmem>>, %arg6: memref<8x1xf32, #tpu.memory_space<vmem>>, %arg7: memref<1x8x128xf32, #tpu.memory_space<vmem>>, %arg8: memref<1x1x1x4xf32, #tpu.memory_space<vmem>>, %arg9: memref<1x1x1x1xf32, #tpu.memory_space<vmem>>) attributes {dimension_semantics = [#tpu.dimension_semantics<parallel>, #tpu.dimension_semantics<parallel>], iteration_bounds = array<i64: 2, 2>, scalar_prefetch = 0 : i64, scratch_operands = 0 : i64, tpu.core_type = #tpu.core_type<tc>, window_params = [{transform_indices = @transform_0, window_bounds = array<i64: 1, 4, 128>}, {pipeline_mode = #tpu.pipeline_mode<synchronous>, transform_indices = @transform_1, window_bounds = array<i64: 32, 4>}, {pipeline_mode = #tpu.pipeline_mode<synchronous>, transform_indices = @transform_2, window_bounds = array<i64: 32, 1>}, {pipeline_mode = #tpu.pipeline_mode<synchronous>, transform_indices = @transform_3, window_bounds = array<i64: 8, 32>}, {pipeline_mode = #tpu.pipeline_mode<synchronous>, transform_indices = @transform_4, window_bounds = array<i64: 8, 1>}, {transform_indices = @transform_5, window_bounds = array<i64: 1, 8, 128>}, {transform_indices = @transform_6, window_bounds = array<i64: 1, 1, 1, 4>}, {transform_indices = @transform_7, window_bounds = array<i64: 1, 1, 1, 1>}]} {
    %c0 = arith.constant 0 : index
    %c0_0 = arith.constant 0 : index
    %c0_1 = arith.constant 0 : index
    %0 = vector.load %arg2[%c0, %c0_0, %c0_1] : memref<1x4x128xf32, #tpu.memory_space<vmem>>, vector<1x4x128xf32>
    %1 = vector.shape_cast %0 : vector<1x4x128xf32> to vector<4x128xf32>
    %cst = arith.constant dense<0.000000e+00> : vector<4xf32>
    %2 = vector.multi_reduction <add>, %1, %cst [1] : vector<4x128xf32> to vector<4xf32>
    %3 = vector.shape_cast %2 : vector<4xf32> to vector<1x1x1x4xf32>
    %c0_2 = arith.constant 0 : index
    %c0_3 = arith.constant 0 : index
    %c0_4 = arith.constant 0 : index
    %c0_5 = arith.constant 0 : index
    %4 = vector.load %arg8[%c0_2, %c0_3, %c0_4, %c0_5] : memref<1x1x1x4xf32, #tpu.memory_space<vmem>>, vector<1x1x1x4xf32>
    tpu.vector_store %arg8[%c0_2, %c0_3, %c0_4, %c0_5], %3 {strides = array<i32>} : memref<1x1x1x4xf32, #tpu.memory_space<vmem>>, vector<1x1x1x4xf32>,
    %c0_6 = arith.constant 0 : index
    %c0_7 = arith.constant 0 : index
    %5 = vector.load %arg3[%c0_6, %c0_7] : memref<32x4xf32, #tpu.memory_space<vmem>>, vector<32x4xf32>
    %cst_8 = arith.constant dense<0.000000e+00> : vector<32x128xf32>
    %6 = tpu.matmul %5, %1, %cst_8 {dimension_numbers = #tpu.dot_dimension_numbers<[1], [0], [0], [1], [0, 0, 1, 1], [], []>} : vector<32x4xf32>, vector<4x128xf32>, vector<32x128xf32> -> vector<32x128xf32>
    %c0_9 = arith.constant 0 : index
    %c0_10 = arith.constant 0 : index
    %7 = vector.load %arg4[%c0_9, %c0_10] : memref<32x1xf32, #tpu.memory_space<vmem>>, vector<32x1xf32>
    %8 = vector.broadcast %7 : vector<32x1xf32> to vector<32x128xf32>
    %9 = arith.addf %6, %8 : vector<32x128xf32>
    %cst_11 = arith.constant 0.000000e+00 : f32
    %10 = vector.broadcast %cst_11 : f32 to vector<32x128xf32>
    %11 = arith.maximumf %9, %10 : vector<32x128xf32>
    %c0_12 = arith.constant 0 : index
    %c0_13 = arith.constant 0 : index
    %12 = vector.load %arg5[%c0_12, %c0_13] : memref<8x32xf32, #tpu.memory_space<vmem>>, vector<8x32xf32>
    %cst_14 = arith.constant dense<0.000000e+00> : vector<8x128xf32>
    %13 = tpu.matmul %12, %11, %cst_14 {dimension_numbers = #tpu.dot_dimension_numbers<[1], [0], [0], [1], [0, 0, 1, 1], [], []>} : vector<8x32xf32>, vector<32x128xf32>, vector<8x128xf32> -> vector<8x128xf32>
    %c0_15 = arith.constant 0 : index
    %c0_16 = arith.constant 0 : index
    %14 = vector.load %arg6[%c0_15, %c0_16] : memref<8x1xf32, #tpu.memory_space<vmem>>, vector<8x1xf32>
    %15 = vector.broadcast %14 : vector<8x1xf32> to vector<8x128xf32>
    %16 = arith.addf %13, %15 : vector<8x128xf32>
    %c0_17 = arith.constant 0 : index
    %c0_18 = arith.constant 0 : index
    %c0_19 = arith.constant 0 : index
    %17 = vector.load %arg7[%c0_17, %c0_18, %c0_19] : memref<1x8x128xf32, #tpu.memory_space<vmem>>, vector<1x8x128xf32>
    %18 = vector.shape_cast %17 : vector<1x8x128xf32> to vector<8x128xf32>
    %19 = vector.shape_cast %16 : vector<8x128xf32> to vector<1x8x128xf32>
    tpu.vector_store %arg7[%c0_17, %c0_18, %c0_19], %19 {strides = array<i32>} : memref<1x8x128xf32, #tpu.memory_space<vmem>>, vector<1x8x128xf32>,
    %20 = vector.shape_cast %16 : vector<8x128xf32> to vector<1x8x128xf32>
    %cst_20 = arith.constant dense<0.000000e+00> : vector<1xf32>
    %21 = vector.multi_reduction <add>, %20, %cst_20 [1, 2] : vector<1x8x128xf32> to vector<1xf32>
    %22 = vector.shape_cast %21 : vector<1xf32> to vector<1x1x1xf32>
    %23 = vector.extract %22[0, 0, 0] : f32 from vector<1x1x1xf32>
    %24 = vector.broadcast %23 : f32 to vector<1x1x1x1xf32>
    %c0_21 = arith.constant 0 : index
    %c0_22 = arith.constant 0 : index
    %c0_23 = arith.constant 0 : index
    %c0_24 = arith.constant 0 : index
    %25 = vector.load %arg9[%c0_21, %c0_22, %c0_23, %c0_24] : memref<1x1x1x1xf32, #tpu.memory_space<vmem>>, vector<1x1x1x1xf32>
    tpu.vector_store %arg9[%c0_21, %c0_22, %c0_23, %c0_24], %24 {strides = array<i32>} : memref<1x1x1x1xf32, #tpu.memory_space<vmem>>, vector<1x1x1x1xf32>,
    return
  }
  func.func @transform_0(%arg0: i32, %arg1: i32) -> (i32, i32, i32) {
    %c0_i32 = arith.constant 0 : i32
    %c0_i32_0 = arith.constant 0 : i32
    return %arg0, %c0_i32, %arg1 : i32, i32, i32
  }
  func.func @transform_1(%arg0: i32, %arg1: i32) -> (i32, i32) {
    %c0_i32 = arith.constant 0 : i32
    %c0_i32_0 = arith.constant 0 : i32
    %c0_i32_1 = arith.constant 0 : i32
    return %c0_i32, %c0_i32_0 : i32, i32
  }
  func.func @transform_2(%arg0: i32, %arg1: i32) -> (i32, i32) {
    %c0_i32 = arith.constant 0 : i32
    %c0_i32_0 = arith.constant 0 : i32
    %c0_i32_1 = arith.constant 0 : i32
    return %c0_i32, %c0_i32_0 : i32, i32
  }
  func.func @transform_3(%arg0: i32, %arg1: i32) -> (i32, i32) {
    %c0_i32 = arith.constant 0 : i32
    %c0_i32_0 = arith.constant 0 : i32
    %c0_i32_1 = arith.constant 0 : i32
    return %c0_i32, %c0_i32_0 : i32, i32
  }
  func.func @transform_4(%arg0: i32, %arg1: i32) -> (i32, i32) {
    %c0_i32 = arith.constant 0 : i32
    %c0_i32_0 = arith.constant 0 : i32
    %c0_i32_1 = arith.constant 0 : i32
    return %c0_i32, %c0_i32_0 : i32, i32
  }
  func.func @transform_5(%arg0: i32, %arg1: i32) -> (i32, i32, i32) {
    %c0_i32 = arith.constant 0 : i32
    %c0_i32_0 = arith.constant 0 : i32
    return %arg0, %c0_i32, %arg1 : i32, i32, i32
  }
  func.func @transform_6(%arg0: i32, %arg1: i32) -> (i32, i32, i32, i32) {
    %c0_i32 = arith.constant 0 : i32
    %c0_i32_0 = arith.constant 0 : i32
    %c0_i32_1 = arith.constant 0 : i32
    return %arg0, %arg1, %c0_i32, %c0_i32_0 : i32, i32, i32, i32
  }
  func.func @transform_7(%arg0: i32, %arg1: i32) -> (i32, i32, i32, i32) {
    %c0_i32 = arith.constant 0 : i32
    %c0_i32_0 = arith.constant 0 : i32
    %c0_i32_1 = arith.constant 0 : i32
    return %arg0, %arg1, %c0_i32, %c0_i32_0 : i32, i32, i32, i32
  }
}

</mosaic_0001>

<bundles_post_ra>
// kernel: tpu_custom_call.1
= control target key start
LH: loop header
LB: loop body
LE: loop exit
PB: predicated region body
PF: predicated region fallthrough
CT: control target
= control target key end

     0   :  { %s1284_s0 = inlined_call_operand.vmem [shape: f32[2,4,256], index: 0, kind: input, shape index: {}]   ;;  %s1285_s1 = inlined_call_operand.vmem [shape: f32[32,4], index: 1, kind: input, shape index: {}]   ;;  %s1286_s2 = inlined_call_operand.vmem [shape: f32[32,1], index: 2, kind: input, shape index: {}]   ;;  %s1287_s3 = inlined_call_operand.vmem [shape: f32[8,32], index: 3, kind: input, shape index: {}]   ;;  %s1288_s4 = inlined_call_operand.vmem [shape: f32[8,1], index: 4, kind: input, shape index: {}]   ;;  %s1289_s5 = inlined_call_operand.hbm [shape: f32[2,8,256], index: 5, kind: output, shape index: {0}]   ;;  %s1290_s6 = inlined_call_operand.hbm [shape: f32[2,2,1,4], index: 6, kind: output, shape index: {1}]   ;;  %s1291_s7 = inlined_call_operand.vmem [shape: f32[2,2,1,1], index: 7, kind: output, shape index: {2}]  }
   0x1   :  { %1295 = sst [smem:[#allocation11_spill]] %s1284_s0 }
   0x2   :  { %1296 = sst [smem:[#allocation12_spill]] %s1285_s1 }
   0x3   :  { %13 = vsyncpa [#allocation3], 0 }
   0x4   :  { %15 = vsyncpa [#allocation3 + $0x1], 0 }
   0x5   :  { %16 = vsyncpa [#allocation5], 0 }
   0x6   :  { %18 = vsyncpa [#allocation5 + $0x1], 0  ;;  %s1073_s24 = smov 0   ;;  %s1075_s25 = smov 0  }
   0x7   :  { %s1077_s26 = smov 0   ;;  %s1079_s27 = smov 0  }
   0x8   :  { %s1081_s28 = smov 0   ;;  %s1083_s29 = smov 0  }
   0x9   :  { %s1085_s30 = smov 0   ;;  %s1087_s8 = smov 0  }
   0xa LB: > { %1297 = sst [smem:[#allocation8_spill]] %s1021_s30  ;;  %s758_s9 = sadd.s32 4294967295, %s1025_s8   ;;  %s1025_s8 = sphi %s1087_s8, %s24_s8   ;;  %s1021_s30 = sphi %s1085_s30, %s1306_s30   ;;  %s1017_s29 = sphi %s1083_s29, %s1311_s29   ;;  %s1013_s28 = sphi %s1081_s28, %s1304_s28   ;;  %s1009_s27 = sphi %s1079_s27, %s1310_s27   ;;  %s1005_s26 = sphi %s1077_s26, %s1309_s26   ;;  %s1001_s25 = sphi %s1075_s25, %s1308_s25   ;;  %s997_s24 = sphi %s1073_s24, %s1307_s24  }
   0xb   : > { %s759_s10 = sadd.s32 4294967294, %s1025_s8   ;;  %s33_s11 = sadd.s32 1, %s1017_s29 }
   0xc   : > { %p34_p0 = scmp.ge.s32.totalorder %s33_s11, 2  ;;  %s36_s12 = sadd.s32 1, %s1021_s30 }
   0xd   : > { %p167_p1 = scmp.ne.s32.totalorder %s1005_s26, %s1001_s25  ;;  %p168_p2 = scmp.eq.s32.totalorder %s758_s9, 3 }
   0xe   : > { %s1313_s11 = smov (%p34_p0, %s33_s11), 0  ;;  %s1315_s12 = smov (!%p34_p0, %s36_s12), %s1021_s30 }
   0xf   : > { %1298 = sst [smem:[#allocation9_spill]] %s1313_s11  ;;  %s153_s13 = ssub.s32 %s1017_s29, %s1313_s11 }
  0x10   : > { %p1124_p3 = por %p168_p2, %p167_p1  ;;  %p38_p4 = scmp.ge.s32.totalorder %s1315_s12, 2 }
  0x11   : > { %p173_p5 = scmp.ne.s32.totalorder %s1001_s25, %s997_s24  ;;  %p174_p6 = scmp.eq.s32.totalorder %s759_s10, 3 }
  0x12   : > { %p762_p7 = scmp.ge.s32.totalorder %s1025_s8, 1  ;;  %s1317_s12 = smov (%p38_p4, %s1315_s12), 0 }
  0x13   : > { %1300 = sst [smem:[#allocation10_spill]] %s1317_s12  ;;  %p1133_p8 = por %p174_p6, %p173_p5 }
  0x14   : > { %p271_p9 = scmp.lt.s32.totalorder %s1025_s8, 5  ;;  %s152_s16 = ssub.s32 %s1021_s30, %s1317_s12 }
  0x15   : > { %s157_s17 = sadd.s32 1, %s1005_s26  ;;  %s154_s18 = sor.u32 %s153_s13, %s152_s16 }
  0x16   : > { %p272_p10 = pnand %p762_p7, %p271_p9  ;;  %p155_p11 = scmp.eq.s32.totalorder %s154_s18, 0 }
  0x17   : > { %p317_p12 = scmp.lt.s32.totalorder (!%p272_p10), %s1013_s28, 1  ;;  %p319_p13 = scmp.lt.s32.totalorder (!%p272_p10), %s1009_s27, 1  ;;  %vm375_vm0 = vcmask (!%p272_p10), 31744   ;;  %v351_v1 = vld [vmem:[%s1286_s2] sm:$0xff] (!%p272_p10)  ;;  %v1027_v2 = vmov (!%p272_p10), 0   ;;  %v353_v3 = vld [vmem:[%s1286_s2 + $0x10] sm:$0xff] (!%p272_p10)  ;;  %v338_v37 = vlaneseq (!%p272_p10) }
  0x18   : > { %s1142_s19 = scalar_select %p155_p11, %s1005_s26, %s157_s17  }
  0x19   : > { %275 = sbr.rel (%p272_p10) target bundleno = 687 (0x2af), region = 40  ;;  %s1302_s1 = sld [smem:[#allocation12_spill]] (!%p272_p10)  ;;  %897 = vset.pattern.permute.xlu0 (!%p272_p10), %v1027_v2  ;;  %898 = vset.pattern.permute.xlu1 (!%p272_p10), %v1027_v2  ;;  %v352_v4 = vld [vmem:[%s1286_s2 + $0x8] sm:$0xff] (!%p272_p10)  ;;  %v354_v5 = vld [vmem:[%s1286_s2 + $0x18] sm:$0xff] (!%p272_p10)  ;;  %vm333_vm1 = vcmask (!%p272_p10), 1043456   ;;  %v481_v8 = vld [vmem:[%s1288_s4] sm:$0xff] (!%p272_p10) }
  0x1a   : > { %357 = vperm.xlu0 (!%p272_p10), %897, %v351_v1   ;;  %367 = vperm.xlu1 (!%p272_p10), %898, %v353_v3   ;;  %s1303_s0 = sld [smem:[#allocation11_spill]] (!%p272_p10)  ;;  %v1028_v11 = vmov (!%p272_p10), 0.0|0.0   ;;  %vm1029_vm2 = vmmov (!%p272_p10), 0   ;;  %v1030_v12 = vmov (!%p272_p10), 0.0   ;;  %v480_v31 = vld [vmem:[%s1287_s3] sm:$0xff] (!%p272_p10)  ;;  %vm487_vm3 = vcmask (!%p272_p10), 261120  }
  0x1b   : > { %809 = vmatprep.subr.bf16.mxu1 (!%p272_p10), %v1028_v11  ;;  %806 = vmatprep.mubr.msk.f32.mxu1 (!%p272_p10), %vm1029_vm2, %v1030_v12  ;;  %v339_v38 = vand.u32 (!%p272_p10), 127, %v338_v37  ;;  %v341_v39 = vshrl.u32 (!%p272_p10), %v338_v37, 7  ;;  %vm345_vm4 = vcmask (!%p272_p10), 24576  }
  0x1d   : > { %v342_v40 = vsub.s32 (!%p272_p10), %v339_v38, %v341_v39 }
  0x1e   : > { %362 = vperm.xlu0 (!%p272_p10), %897, %v352_v4   ;;  %372 = vperm.xlu1 (!%p272_p10), %898, %v354_v5  }
  0x1f   : > { %v347_v0 = vld [vmem:[%s1302_s1] sm:$0xff] (!%p272_p10)  ;;  %v348_v7 = vld [vmem:[%s1302_s1 + $0x8] sm:$0xff] (!%p272_p10)  ;;  %v349_v9 = vld [vmem:[%s1302_s1 + $0x10] sm:$0xff] (!%p272_p10) }
  0x20   : > { %792 = vmatprep.mubr.msk.f32.mxu0 %vm375_vm0, %v347_v0  ;;  %s318_s9 = scalar_select %p317_p12, %s1013_s28, 1  ;;  %v350_v10 = vld [vmem:[%s1302_s1 + $0x18] sm:$0xff] }
  0x21   : > { %s320_s16 = scalar_select %p319_p13, %s1009_s27, 1 }
  0x22   : > { %s764_s17 = sshll.u32 %s318_s9, 1  ;;  %484 = vperm.xlu0 %897, %v481_v8   ;;  %s774_s9 = sshll.u32 %s1013_s28, 1 }
  0x23   : > { %s1164_s22 = sadd.s32 %s764_s17, %s320_s16  ;;  %s1197_s18 = sadd.s32 %s1009_s27, %s774_s9 }
  0x24   : > { %s765_s23 = sshll.u32 %s1164_s22, 2  ;;  %s775_s20 = sshll.u32 %s1197_s18, 7 }
  0x25   : > { %s324_s13 = scalar_lea.vmem %s1303_s0, %s765_s23  ;;  %s1192_s23 = sand.u32 1, %s1001_s25  }
  0x26   : > { %v332_v6 = vld [vmem:[%s324_s13] sm:$0xf]  ;;  %s763_s10 = sshll.u32 %s1192_s23, 3  ;;  %s1203_s30 = scalar_lea.hbm %s1289_s5, %s775_s20 }
  0x27   : > { %790 = vmatprep.subr.msk.mxu0 %vm333_vm1, %v332_v6  ;;  %v334_v32 = vsel %vm333_vm1, %v332_v6, 0.0  ;;  %s301_s13 = scalar_lea.vmem [#allocation2], %s763_s10  ;;  %s307_s17 = scalar_lea.vmem [#allocation4], %s1192_s23 }
  0x28   : > { %791 = vmatpush3.msk.msra.mxu0 %vm333_vm1, %v332_v6  ;;  %s601_s12 = sshll.u32 %s301_s13, 4  ;;  %s575_s21 = scalar_lea.sflag [#allocation3], %s1192_s23  ;;  %s602_s12 = int_to_ptr.vmem [resolvable:$true] %s601_s12 }
  0x29   : > { %793 = vmatmul.mubr.msk.f32.vlgmr.msra.gmra.mrb[0].mxu0 %vm375_vm0, %v348_v7  ;;  %s899_s10 = scalar_lea.vmem %s602_s12, 128  ;;  %s1031_s27 = smov [#allocation2]  }
  0x2a   : > { %795 = vmatprep.mubr.msk.f32.mxu0 %vm375_vm0, %v349_v9  ;;  %p900_p0 = scmp.ne.s32.totalorder %s602_s12, %s899_s10  ;;  %s903_s28 = sshll.u32 %s1031_s27, 4  ;;  %s904_s28 = int_to_ptr.vmem [resolvable:$false] %s903_s28 }
  0x2b   : > { %p906_p4 = scmp.lt.s32.totalorder %s602_s12, %s904_s28 }
  0x2c   : > { %p901_p1 = pnand %p900_p0, %p1124_p3 }
  0x2d   : > { %796 = vmatmul.mubr.msk.f32.gmra.mrb[2].mxu0 %vm375_vm0, %v350_v10 }
  0x2e   : > { %p902_p2 = pneg %p901_p1 }
  0x41   : > { %335 = vadd.xlane.f32.xlu0 %v334_v32 }
  0x99   : > { %v358_v13 = vpop.permute.xlu0 %357  ;;  %v368_v14 = vpop.permute.xlu1 %367 }
  0x9d   : > { %v363_v15 = vpop.permute.xlu0 %362  ;;  %v373_v21 = vpop.permute.xlu1 %372 }
  0xa1   : > { %v485_v33 = vpop.permute.xlu0 %484 }
  0xce   : > { %v336_v41 = vpop.xlane.xlu0 %335 }
  0xcf   : > { %v343_v42 = vrot.slane %v336_v41, %v342_v40 }
  0xd1   : > { %346 = vst.msk [vmem:[%s307_s17] sm:$0x1] %vm345_vm4, %v343_v42 }
  0xfc   : > { %v794_v16 = vpop.f32.mrb[0].mxu0 }
  0xfd   : > { %v463_v17 = vadd.f32 %v794_v16, %v363_v15  ;;  %v457_v18 = vpop.f32.mrb[1].mxu0 }
  0xfe   : > { %v458_v19 = vadd.f32 %v457_v18, %v358_v13 }
  0xff   : > { %v477_v20 = vmax.f32 %v463_v17, 0.0 }
 0x100   : > { %v476_v22 = vmax.f32 %v458_v19, 0.0  ;;  %v797_v23 = vpop.f32.mrb[2].mxu0 }
 0x101   : > { %v473_v24 = vadd.f32 %v797_v23, %v373_v21  ;;  %v467_v25 = vpop.f32.mrb[3].mxu0 }
 0x102   : > { %v468_v26 = vadd.f32 %v467_v25, %v368_v14  ;;  %v810_v27 = vpack.c.bf16 %v477_v20, %v476_v22 }
 0x103   : > { %v479_v28 = vmax.f32 %v473_v24, 0.0 }
 0x104   : > { %v478_v29 = vmax.f32 %v468_v26, 0.0  ;;  %811 = vmatpush3.bf16.msra.mxu1 %v810_v27 }
 0x105   : > { %812 = vmatprep.subr.bf16.mxu1 %v1028_v11 }
 0x106   : > { %v813_v30 = vpack.c.bf16 %v479_v28, %v478_v29 }
 0x108   : > { %814 = vmatpush3.bf16.msra.mxu1 %v813_v30 }
 0x10b   : > { %807 = vmatmul.mubr.msk.f32.vlgmr.msra.gmra.mrb[0].mxu1 %vm487_vm3, %v480_v31 }
 0x1de   : > { %v557_v34 = vpop.f32.mrb[0].mxu1 }
 0x1df   : > { %v558_v35 = vadd.f32 %v557_v34, %v485_v33  ;;  %v808_v36 = vpop.f32.mrb[1].mxu1 }
 0x1e1   : > { %561 = vst [vmem:[%s301_s13] sm:$0xff] %v558_v35  ;;  %562 = vadd.xlane.f32.xlu1 %v558_v35  ;;  %s905_s13 = scalar_lea.vmem %s904_s28, 256 }
 0x1e2   : > { %p907_p5 = scmp.lt.s32.totalorder %s905_s13, %s899_s10 }
 0x1e4   : > { %p908_p6 = por %p907_p5, %p906_p4 }
 0x1e6   : > { %p909_p7 = pnand %p908_p6, %p902_p2 }
 0x1e8   : > { %912 = shalt.err (!%p909_p7)
}
 0x1e9   : > { %s913_s9 = scalar_lea.hbm %s1203_s30, 128  ;;  %s917_s11 = scalar_lea.hbm %s1289_s5, 512 }
 0x1ea   : > { %p914_p9 = scmp.ne.s32.totalorder %s1203_s30, %s913_s9  ;;  %p918_p12 = scmp.lt.u32.totalorder %s1203_s30, %s1289_s5 }
 0x1eb   : > { %p919_p13 = scmp.lt.u32.totalorder %s917_s11, %s913_s9  ;;  %p921_p1 = scmp.lt.u32.totalorder %s913_s9, %s1203_s30 }
 0x1ec   : > { %p915_p10 = pnand %p914_p9, %p1124_p3 }
 0x1ed   : > { %p920_p0 = por %p919_p13, %p918_p12 }
 0x1ee   : > { %p916_p11 = pneg %p915_p10 }
 0x1ef   : > { %p922_p2 = por %p921_p1, %p920_p0 }
 0x1f1   : > { %p923_p4 = pnand %p922_p2, %p916_p11 }
 0x1f3   : > { %926 = shalt.err (!%p923_p4)
}
 0x1f4   : > { %817 = dma.vmem_to_hbm [thread:$0]  (%p1124_p3), %s602_s12, 128, %s1203_s30, %s575_s21  }
 0x1f5   : > { %s777_s10 = sshll.u32 %s1197_s18, 4  ;;  %s616_s13 = sshll.u32 %s307_s17, 4  ;;  %s617_s13 = int_to_ptr.vmem [resolvable:$true] %s616_s13 }
 0x1f6   : > { %s1232_s11 = scalar_lea.hbm %s1290_s6, %s777_s10  ;;  %s580_s9 = scalar_lea.sflag [#allocation5], %s1192_s23 }
 0x1f7   : > { %s927_s27 = scalar_lea.vmem %s617_s13, 16  ;;  %s1032_s28 = smov [#allocation4]  }
 0x1f8   : > { %p928_p5 = scmp.ne.s32.totalorder %s617_s13, %s927_s27  ;;  %s931_s0 = sshll.u32 %s1032_s28, 4  ;;  %s932_s0 = int_to_ptr.vmem [resolvable:$false] %s931_s0 }
 0x1f9   : > { %s933_s1 = scalar_lea.vmem %s932_s0, 32  ;;  %p934_p9 = scmp.lt.s32.totalorder %s617_s13, %s932_s0 }
 0x1fa   : > { %p929_p6 = pnand %p928_p5, %p1124_p3  ;;  %p935_p10 = scmp.lt.s32.totalorder %s933_s1, %s927_s27 }
 0x1fc   : > { %p930_p7 = pneg %p929_p6  ;;  %p936_p11 = por %p935_p10, %p934_p9 }
 0x1fe   : > { %p937_p12 = pnand %p936_p11, %p930_p7 }
 0x200   : > { %940 = shalt.err (!%p937_p12)
}
 0x201   : > { %s941_s23 = scalar_lea.hbm %s1232_s11, 16  ;;  %s945_s30 = scalar_lea.hbm %s1290_s6, 64 }
 0x202   : > { %p942_p13 = scmp.ne.s32.totalorder %s1232_s11, %s941_s23  ;;  %p946_p2 = scmp.lt.u32.totalorder %s1232_s11, %s1290_s6 }
 0x203   : > { %p947_p4 = scmp.lt.u32.totalorder %s945_s30, %s941_s23  ;;  %p949_p6 = scmp.lt.u32.totalorder %s941_s23, %s1232_s11 }
 0x204   : > { %p943_p0 = pnand %p942_p13, %p1124_p3 }
 0x205   : > { %p948_p5 = por %p947_p4, %p946_p2 }
 0x206   : > { %p944_p1 = pneg %p943_p0 }
 0x207   : > { %p950_p7 = por %p949_p6, %p948_p5 }
 0x209   : > { %p951_p9 = pnand %p950_p7, %p944_p1 }
 0x20b   : > { %954 = shalt.err (!%p951_p9)
}
 0x20c   : > { %818 = dma.vmem_to_hbm [thread:$0]  (%p1124_p3), %s617_s13, 16, %s1232_s11, %s580_s9   ;;  %vm572_vm5 = vcmask 0  }
 0x20d   : > { %s331_s10 = scalar_lea.vmem %s1291_s7, %s1164_s22 }
 0x26e   : > { %v563_v43 = vpop.xlane.xlu1 %562 }
 0x26f   : > { %v564_v44 = vrot.slane %v563_v43, 4 }
 0x271   : > { %v565_v45 = vadd.f32 %v564_v44, %v563_v43 }
 0x273   : > { %v566_v46 = vrot.slane %v565_v45, 2 }
 0x275   : > { %v567_v47 = vadd.f32 %v566_v46, %v565_v45 }
 0x277   : > { %v568_v48 = vrot.slane %v567_v47, 1 }
 0x279   : > { %v569_v49 = vadd.f32 %v568_v48, %v567_v47 }
 0x27b   : > { %815 = vpush %v569_v49 }
 0x2ac   : > { %s816_s20 = spop %815 }
 0x2ad   : > { %v571_v50 = vstv %s816_s20 }
 0x2ae   : > { %573 = vst.msk [vmem:[%s331_s10] sm:$0x1] %vm572_vm5, %v571_v50 }
 0x2af PF: > { %p828_p3 = scmp.ge.s32.totalorder %s1025_s8, 2  ;;  %s631_s14 = sand.u32 1, %s997_s24  }
 0x2b0   : > { %s632_s13 = scalar_lea.sflag [#allocation3], %s631_s14 }
 0x2b1   : > { %p822_p10 = pnand %p828_p3, %p1133_p8 }
 0x2b3   : > { %988 = dma.done.wait (!%p822_p10), %s632_s13, 128  }
 0x2b4   : > { %990 = vsyncadd (!%p822_p10), %s632_s13, 4294967168  ;;  %s641_s16 = scalar_lea.sflag [#allocation5], %s631_s14 }
 0x2b5   : > { %992 = dma.done.wait (!%p822_p10), %s641_s16, 16  }
 0x2b6   : > { %994 = vsyncadd (!%p822_p10), %s641_s16, 4294967280  ;;  %s24_s8 = sadd.s32 1, %s1025_s8   ;;  %s1304_s28 = sld [smem:[#allocation8_spill]] }
 0x2b7   : > { %p21_p11 = scmp.ge.s32.totalorder %s24_s8, 6   ;;  %s1305_s22 = sld [smem:[#allocation9_spill]] }
 0x2b8   : > { %s1306_s30 = sld [smem:[#allocation10_spill]]  ;;  %s1307_s24 = smov %s1001_s25 }
 0x2b9   : > { %s1308_s25 = smov %s1005_s26  ;;  %s1309_s26 = smov %s1142_s19 }
 0x2ba   : > { %s1310_s27 = smov %s1017_s29  ;;  %23 = sbr.rel (!%p21_p11) target bundleno = 10 (0xa), region = 104 }
 0x2bd   : > { %s1311_s29 = smov %s1305_s22 }
 0x2c1   :  { %655 = vsyncpa [#allocation3], 1 }
 0x2c2   :  { %657 = vsyncpa [#allocation3 + $0x1], 1 }
 0x2c3   :  { %658 = vsyncpa [#allocation5], 1 }
 0x2c4   :  { %660 = vsyncpa [#allocation5 + $0x1], 1 }

</bundles_post_ra>
